<compile_context>
chip_gen: v5e
topology: v5e:2x2
jax: 0.10.0
libtpu: 0.0.40
codegen_flags: <defaults>
</compile_context>

<pallas_src>
import functools

import jax
import jax.numpy as jnp
import numpy as np
from jax.experimental import pallas as pl
from jax.experimental.pallas import tpu as pltpu

BN_EPS = 1e-5


def _mgf_kernel(P, B, H, F, mm_dtype,
                particles_ref, weight_ref, mgf_wT_ref, bn_gb_ref,
                merge_all_ref, batch_sel_ref, out_ref):
    """One full problem instance, fully resident in VMEM."""
    PB = P * B

    x = particles_ref[...]                                   # (PB, H), input dtype
    ew = jnp.exp(weight_ref[...].astype(jnp.float32))        # (PB, 1) exp(log-weight)

    # ---- mgf_fc (bias-free linear) on the MXU --------------------------------
    mgf = jnp.dot(x.astype(mm_dtype), mgf_wT_ref[...].astype(mm_dtype),
                  preferred_element_type=jnp.float32)        # (PB, F), f32

    # ---- BatchNorm1d(num_particles), training-mode stats, 2-D layout ---------
    # Per-row moments over the lane axis (F); per-particle fold via a static
    # 0/1 selector matmul (MXU) instead of a (P,B,F) reshape + XLU reduce.
    s1 = jnp.sum(mgf, axis=1, keepdims=True)                 # (PB, 1)
    s2 = jnp.sum(mgf * mgf, axis=1, keepdims=True)           # (PB, 1)

    # part_sel[p, j] = 1 iff row j belongs to particle p (j in [p*B, (p+1)*B))
    pr = jax.lax.broadcasted_iota(jnp.int32, (P, PB), 0)
    pc = jax.lax.broadcasted_iota(jnp.int32, (P, PB), 1)
    part_sel = ((pc >= pr * B) & (pc < pr * B + B)).astype(jnp.float32)

    inv_cnt = 1.0 / float(B * F)
    mu_p = jnp.dot(part_sel, s1, preferred_element_type=jnp.float32) * inv_cnt   # (P,1)
    ex2_p = jnp.dot(part_sel, s2, preferred_element_type=jnp.float32) * inv_cnt  # (P,1)
    var_p = ex2_p - mu_p * mu_p                              # biased variance

    gamma_p = bn_gb_ref[:, 0:1]                              # (P, 1)
    beta_p = bn_gb_ref[:, 1:2]                               # (P, 1)
    scale_p = gamma_p * jax.lax.rsqrt(var_p + BN_EPS)        # (P, 1)
    shift_p = beta_p - mu_p * scale_p                        # (P, 1)

    # Broadcast per-particle affine to rows with another selector matmul
    # (row_sel = part_sel^T, built directly with iota -> no transpose relayout).
    rr = jax.lax.broadcasted_iota(jnp.int32, (PB, P), 0)
    rc = jax.lax.broadcasted_iota(jnp.int32, (PB, P), 1)
    row_sel = ((rr >= rc * B) & (rr < rc * B + B)).astype(jnp.float32)
    scale_row = jnp.dot(row_sel, scale_p, preferred_element_type=jnp.float32)  # (PB,1)
    shift_row = jnp.dot(row_sel, shift_p, preferred_element_type=jnp.float32)  # (PB,1)

    mgf_n = jnp.maximum(mgf * scale_row + shift_row, 0.0)    # BN + relu, (PB, F)

    # ---- exp(weight)-weighted reduction over particles: selector matmul ------
    # batch_sel[b, j] = 1 iff row j belongs to batch element b (j % B == b).
    batch_sel = batch_sel_ref[...].astype(mm_dtype)          # (B, PB)
    wx = (ew * x.astype(jnp.float32)).astype(mm_dtype)       # (PB, H)
    wm = (ew * mgf_n).astype(mm_dtype)                       # (PB, F)
    mean_b = jnp.dot(batch_sel, wx, preferred_element_type=jnp.float32)   # (B, H)
    mgfagg = jnp.dot(batch_sel, wm, preferred_element_type=jnp.float32)   # (B, F)

    # ---- merge_fc split K-wise (no lane concat) + relu ------------------------
    w_mean = merge_all_ref[0:H, :].astype(mm_dtype)          # (H, H)
    w_mgf = merge_all_ref[H:H + F, :].astype(mm_dtype)       # (F, H)
    bias = merge_all_ref[H + F:H + F + 1, :]                 # (1, H), f32
    merged = (jnp.dot(mean_b.astype(mm_dtype), w_mean,
                      preferred_element_type=jnp.float32)
              + jnp.dot(mgfagg.astype(mm_dtype), w_mgf,
                        preferred_element_type=jnp.float32)
              + bias)
    out_ref[...] = jnp.maximum(merged, 0.0).astype(out_ref.dtype)


def _build_batch_selector(P, B):
    """(B, P*B) 0/1 selector: sel[b, j] = 1 iff j % B == b."""
    col = jnp.arange(P * B, dtype=jnp.int32) % B
    return (col[None, :] == jnp.arange(B, dtype=jnp.int32)[:, None]).astype(jnp.float32)


def mgf_aggregator_forward_batched(particles, weight, params, *,
                                   num_particles, num_features, h_dim,
                                   matmul_dtype=jnp.float32):
    """N independent MGF_Aggregator instances over a parallel grid axis.

    particles: (N, num_particles * batch, h_dim)
    weight   : (N, num_particles * batch, 1) log-weights
    returns  : merged (N, batch, h_dim)
    """
    P, F, H = num_particles, num_features, h_dim
    N, PB, Hin = particles.shape
    assert Hin == H and PB % P == 0
    B = PB // P

    mgf_wT = params["mgf_w"].T.astype(jnp.float32)                        # (H, F)
    merge_all = jnp.concatenate(
        [params["merge_w"].T.astype(jnp.float32),
         params["merge_b"].reshape(1, H).astype(jnp.float32)], axis=0)    # (H+F+1, H)
    bn_gb = jnp.stack([params["bn_gamma"].astype(jnp.float32),
                       params["bn_beta"].astype(jnp.float32)], axis=1)    # (P, 2)
    batch_sel = _build_batch_selector(P, B)                               # (B, PB)

    kernel = functools.partial(_mgf_kernel, P, B, H, F, matmul_dtype)

    merged = pl.pallas_call(
        kernel,
        out_shape=jax.ShapeDtypeStruct((N, B, H), jnp.float32),
        grid=(N,),
        in_specs=[
            pl.BlockSpec((None, PB, H), lambda n: (n, 0, 0)),    # particles (per instance)
            pl.BlockSpec((None, PB, 1), lambda n: (n, 0, 0)),    # log-weights (per instance)
            pl.BlockSpec((H, F), lambda n: (0, 0)),              # mgf_fc W^T (resident)
            pl.BlockSpec((P, 2), lambda n: (0, 0)),              # [gamma | beta] packed
            pl.BlockSpec((H + F + 1, H), lambda n: (0, 0)),      # merge W^T + bias row
            pl.BlockSpec((B, PB), lambda n: (0, 0)),             # batch selector (resident)
        ],
        out_specs=pl.BlockSpec((None, B, H), lambda n: (n, 0, 0)),
        compiler_params=pltpu.CompilerParams(
            dimension_semantics=("parallel",)),
    )(particles, weight.reshape(N, PB, 1), mgf_wT, bn_gb, merge_all, batch_sel)
    return merged


def mgf_aggregator_forward(particles, weight, params, *,
                           num_particles, num_features, h_dim,
                           matmul_dtype=jnp.float32):
    """Single-instance wrapper reproducing MGF_Aggregator.forward.

    particles: (num_particles * batch, h_dim)
    weight   : (num_particles * batch, 1)   (log-weights)
    returns  : (merged (batch, h_dim), particles (P*B, h_dim), weight (P*B, 1))
    """
    H = h_dim
    merged = mgf_aggregator_forward_batched(
        particles[None], weight.reshape(1, -1, 1), params,
        num_particles=num_particles, num_features=num_features, h_dim=h_dim,
        matmul_dtype=matmul_dtype)[0]
    return merged, particles.reshape(-1, H), weight.reshape(-1, 1)


def _reference_forward(particles, weight, params, *, num_particles, num_features, h_dim):
    """Pure-JAX mirror of the PyTorch forward (training-mode BatchNorm)."""
    P, F, H = num_particles, num_features, h_dim
    B = particles.shape[0] // P
    mgf = particles @ params["mgf_w"].T                           # (P*B, F)
    mgf = mgf.reshape(P, B, F).transpose(1, 0, 2)                 # (B, P, F)
    mu = mgf.mean(axis=(0, 2), keepdims=True)
    var = ((mgf - mu) ** 2).mean(axis=(0, 2), keepdims=True)
    mgf = (mgf - mu) / jnp.sqrt(var + BN_EPS)
    mgf = mgf * params["bn_gamma"].reshape(1, P, 1) + params["bn_beta"].reshape(1, P, 1)
    mgf = jnp.maximum(mgf, 0.0)
    mgf = mgf.transpose(1, 0, 2)                                  # (P, B, F)
    w = weight.reshape(P, B, 1)
    xr = particles.reshape(P, B, H)
    mean = jnp.sum(xr * jnp.exp(w), axis=0)
    mgf_agg = jnp.sum(mgf * jnp.exp(w), axis=0)
    merged = jnp.concatenate([mean, mgf_agg], axis=1)
    merged = jnp.maximum(merged @ params["merge_w"].T + params["merge_b"], 0.0)
    return merged, particles.reshape(-1, H), weight.reshape(-1, 1)


if __name__ == "__main__":
    num_particles, batch, h_dim, num_features = 8, 4, 32, 16
    P, B, H, F = num_particles, batch, h_dim, num_features

    key = jax.random.PRNGKey(0)
    k_x, k_w, k_p1, k_p2, k_p3, k_xn, k_wn = jax.random.split(key, 7)

    particles = jax.random.normal(k_x, (P * B, H), dtype=jnp.float32)
    weight = (0.1 * jax.random.normal(k_w, (P * B, 1), dtype=jnp.float32)
              - jnp.log(float(P)))

    params = {
        "mgf_w": jax.random.normal(k_p1, (F, H), dtype=jnp.float32) / jnp.sqrt(H),
        "merge_w": jax.random.normal(k_p2, (H, H + F), dtype=jnp.float32) / jnp.sqrt(H + F),
        "merge_b": jax.random.normal(k_p3, (H,), dtype=jnp.float32) * 0.01,
        "bn_gamma": jnp.ones((P,), dtype=jnp.float32),
        "bn_beta": jnp.zeros((P,), dtype=jnp.float32),
    }

    # --- single instance, f32 MXU path (reference-level accuracy) ------------
    merged, parts_out, w_out = mgf_aggregator_forward(
        particles, weight, params, num_particles=P, num_features=F, h_dim=H)
    jax.block_until_ready((merged, parts_out, w_out))

    ref_merged, ref_parts, ref_w = _reference_forward(
        particles, weight, params, num_particles=P, num_features=F, h_dim=H)
    np.testing.assert_allclose(np.asarray(merged), np.asarray(ref_merged),
                               rtol=2e-5, atol=2e-5)
    np.testing.assert_allclose(np.asarray(parts_out), np.asarray(ref_parts))
    np.testing.assert_allclose(np.asarray(w_out), np.asarray(ref_w))

    # --- bf16 MXU operands (native path on v5e/v6e/v7x), looser tolerance ----
    merged_bf16, _, _ = mgf_aggregator_forward(
        particles, weight, params, num_particles=P, num_features=F, h_dim=H,
        matmul_dtype=jnp.bfloat16)
    jax.block_until_ready(merged_bf16)
    np.testing.assert_allclose(np.asarray(merged_bf16), np.asarray(ref_merged),
                               rtol=5e-2, atol=5e-2)

    # --- several independent instances over one "parallel" grid axis ---------
    N = 3
    parts_n = jax.random.normal(k_xn, (N, P * B, H), dtype=jnp.float32)
    w_n = (0.1 * jax.random.normal(k_wn, (N, P * B, 1), dtype=jnp.float32)
           - jnp.log(float(P)))
    merged_n = mgf_aggregator_forward_batched(
        parts_n, w_n, params, num_particles=P, num_features=F, h_dim=H)
    jax.block_until_ready(merged_n)
    for i in range(N):
        ref_i, _, _ = _reference_forward(
            parts_n[i], w_n[i], params, num_particles=P, num_features=F, h_dim=H)
        np.testing.assert_allclose(np.asarray(merged_n[i]), np.asarray(ref_i),
                                   rtol=2e-5, atol=2e-5)

    print("KERNEL_OK")
</pallas_src>

<mosaic_0001>
module attributes {stable_mosaic.version = 11 : i64} {
  func.func @_mgf_kernel(%arg0: i32, %arg1: memref<1x32x32xf32, #tpu.memory_space<vmem>>, %arg2: memref<1x32x1xf32, #tpu.memory_space<vmem>>, %arg3: memref<32x16xf32, #tpu.memory_space<vmem>>, %arg4: memref<8x2xf32, #tpu.memory_space<vmem>>, %arg5: memref<49x32xf32, #tpu.memory_space<vmem>>, %arg6: memref<4x32xf32, #tpu.memory_space<vmem>>, %arg7: memref<1x4x32xf32, #tpu.memory_space<vmem>>) attributes {dimension_semantics = [#tpu.dimension_semantics<parallel>], iteration_bounds = array<i64: 1>, scalar_prefetch = 0 : i64, scratch_operands = 0 : i64, tpu.core_type = #tpu.core_type<tc>, window_params = [{transform_indices = @transform_0, window_bounds = array<i64: 1, 32, 32>}, {transform_indices = @transform_1, window_bounds = array<i64: 1, 32, 1>}, {pipeline_mode = #tpu.pipeline_mode<synchronous>, transform_indices = @transform_2, window_bounds = array<i64: 32, 16>}, {pipeline_mode = #tpu.pipeline_mode<synchronous>, transform_indices = @transform_3, window_bounds = array<i64: 8, 2>}, {pipeline_mode = #tpu.pipeline_mode<synchronous>, transform_indices = @transform_4, window_bounds = array<i64: 49, 32>}, {pipeline_mode = #tpu.pipeline_mode<synchronous>, transform_indices = @transform_5, window_bounds = array<i64: 4, 32>}, {transform_indices = @transform_6, window_bounds = array<i64: 1, 4, 32>}]} {
    %c0 = arith.constant 0 : index
    %c0_0 = arith.constant 0 : index
    %c0_1 = arith.constant 0 : index
    %0 = vector.load %arg1[%c0, %c0_0, %c0_1] : memref<1x32x32xf32, #tpu.memory_space<vmem>>, vector<1x32x32xf32>
    %1 = vector.shape_cast %0 : vector<1x32x32xf32> to vector<32x32xf32>
    %c0_2 = arith.constant 0 : index
    %c0_3 = arith.constant 0 : index
    %c0_4 = arith.constant 0 : index
    %2 = vector.load %arg2[%c0_2, %c0_3, %c0_4] : memref<1x32x1xf32, #tpu.memory_space<vmem>>, vector<1x32x1xf32>
    %3 = vector.shape_cast %2 : vector<1x32x1xf32> to vector<32x1xf32>
    %4 = math.exp %3 : vector<32x1xf32>
    %c0_5 = arith.constant 0 : index
    %c0_6 = arith.constant 0 : index
    %5 = vector.load %arg3[%c0_5, %c0_6] : memref<32x16xf32, #tpu.memory_space<vmem>>, vector<32x16xf32>
    %cst = arith.constant dense<0.000000e+00> : vector<32x16xf32>
    %6 = tpu.matmul %1, %5, %cst {dimension_numbers = #tpu.dot_dimension_numbers<[1], [0], [0], [1], [0, 0, 1, 1], [], []>} : vector<32x32xf32>, vector<32x16xf32>, vector<32x16xf32> -> vector<32x16xf32>
    %cst_7 = arith.constant dense<0.000000e+00> : vector<32xf32>
    %7 = vector.multi_reduction <add>, %6, %cst_7 [1] : vector<32x16xf32> to vector<32xf32>
    %8 = vector.shape_cast %7 : vector<32xf32> to vector<32x1xf32>
    %9 = arith.mulf %6, %6 : vector<32x16xf32>
    %cst_8 = arith.constant dense<0.000000e+00> : vector<32xf32>
    %10 = vector.multi_reduction <add>, %9, %cst_8 [1] : vector<32x16xf32> to vector<32xf32>
    %11 = vector.shape_cast %10 : vector<32xf32> to vector<32x1xf32>
    %12 = tpu.iota {dimensions = array<i32: 0>} : vector<8x32xi32>
    %13 = tpu.iota {dimensions = array<i32: 1>} : vector<8x32xi32>
    %c4_i32 = arith.constant 4 : i32
    %14 = vector.broadcast %c4_i32 : i32 to vector<8x32xi32>
    %15 = arith.muli %12, %14 : vector<8x32xi32>
    %16 = arith.cmpi sge, %13, %15 : vector<8x32xi32>
    %c4_i32_9 = arith.constant 4 : i32
    %17 = vector.broadcast %c4_i32_9 : i32 to vector<8x32xi32>
    %18 = arith.muli %12, %17 : vector<8x32xi32>
    %c4_i32_10 = arith.constant 4 : i32
    %19 = vector.broadcast %c4_i32_10 : i32 to vector<8x32xi32>
    %20 = arith.addi %18, %19 : vector<8x32xi32>
    %21 = arith.cmpi slt, %13, %20 : vector<8x32xi32>
    %22 = arith.andi %16, %21 : vector<8x32xi1>
    %23 = arith.extui %22 : vector<8x32xi1> to vector<8x32xi32>
    %24 = arith.sitofp %23 : vector<8x32xi32> to vector<8x32xf32>
    %cst_11 = arith.constant dense<0.000000e+00> : vector<8x1xf32>
    %25 = tpu.matmul %24, %8, %cst_11 {dimension_numbers = #tpu.dot_dimension_numbers<[1], [0], [0], [1], [0, 0, 1, 1], [], []>} : vector<8x32xf32>, vector<32x1xf32>, vector<8x1xf32> -> vector<8x1xf32>
    %cst_12 = arith.constant 1.562500e-02 : f32
    %26 = vector.broadcast %cst_12 : f32 to vector<8x1xf32>
    %27 = arith.mulf %25, %26 : vector<8x1xf32>
    %cst_13 = arith.constant dense<0.000000e+00> : vector<8x1xf32>
    %28 = tpu.matmul %24, %11, %cst_13 {dimension_numbers = #tpu.dot_dimension_numbers<[1], [0], [0], [1], [0, 0, 1, 1], [], []>} : vector<8x32xf32>, vector<32x1xf32>, vector<8x1xf32> -> vector<8x1xf32>
    %cst_14 = arith.constant 1.562500e-02 : f32
    %29 = vector.broadcast %cst_14 : f32 to vector<8x1xf32>
    %30 = arith.mulf %28, %29 : vector<8x1xf32>
    %31 = arith.mulf %27, %27 : vector<8x1xf32>
    %32 = arith.subf %30, %31 : vector<8x1xf32>
    %c0_15 = arith.constant 0 : index
    %c0_16 = arith.constant 0 : index
    %33 = vector.load %arg4[%c0_15, %c0_16] : memref<8x2xf32, #tpu.memory_space<vmem>>, vector<8x1xf32>
    %c0_17 = arith.constant 0 : index
    %c1 = arith.constant 1 : index
    %34 = vector.load %arg4[%c0_17, %c1] : memref<8x2xf32, #tpu.memory_space<vmem>>, vector<8x1xf32>
    %cst_18 = arith.constant 9.99999974E-6 : f32
    %35 = vector.broadcast %cst_18 : f32 to vector<8x1xf32>
    %36 = arith.addf %32, %35 : vector<8x1xf32>
    %37 = math.rsqrt %36 : vector<8x1xf32>
    %38 = arith.mulf %33, %37 : vector<8x1xf32>
    %39 = arith.mulf %27, %38 : vector<8x1xf32>
    %40 = arith.subf %34, %39 : vector<8x1xf32>
    %41 = tpu.iota {dimensions = array<i32: 0>} : vector<32x8xi32>
    %42 = tpu.iota {dimensions = array<i32: 1>} : vector<32x8xi32>
    %c4_i32_19 = arith.constant 4 : i32
    %43 = vector.broadcast %c4_i32_19 : i32 to vector<32x8xi32>
    %44 = arith.muli %42, %43 : vector<32x8xi32>
    %45 = arith.cmpi sge, %41, %44 : vector<32x8xi32>
    %c4_i32_20 = arith.constant 4 : i32
    %46 = vector.broadcast %c4_i32_20 : i32 to vector<32x8xi32>
    %47 = arith.muli %42, %46 : vector<32x8xi32>
    %c4_i32_21 = arith.constant 4 : i32
    %48 = vector.broadcast %c4_i32_21 : i32 to vector<32x8xi32>
    %49 = arith.addi %47, %48 : vector<32x8xi32>
    %50 = arith.cmpi slt, %41, %49 : vector<32x8xi32>
    %51 = arith.andi %45, %50 : vector<32x8xi1>
    %52 = arith.extui %51 : vector<32x8xi1> to vector<32x8xi32>
    %53 = arith.sitofp %52 : vector<32x8xi32> to vector<32x8xf32>
    %cst_22 = arith.constant dense<0.000000e+00> : vector<32x1xf32>
    %54 = tpu.matmul %53, %38, %cst_22 {dimension_numbers = #tpu.dot_dimension_numbers<[1], [0], [0], [1], [0, 0, 1, 1], [], []>} : vector<32x8xf32>, vector<8x1xf32>, vector<32x1xf32> -> vector<32x1xf32>
    %cst_23 = arith.constant dense<0.000000e+00> : vector<32x1xf32>
    %55 = tpu.matmul %53, %40, %cst_23 {dimension_numbers = #tpu.dot_dimension_numbers<[1], [0], [0], [1], [0, 0, 1, 1], [], []>} : vector<32x8xf32>, vector<8x1xf32>, vector<32x1xf32> -> vector<32x1xf32>
    %56 = vector.broadcast %54 : vector<32x1xf32> to vector<32x16xf32>
    %57 = arith.mulf %6, %56 : vector<32x16xf32>
    %58 = vector.broadcast %55 : vector<32x1xf32> to vector<32x16xf32>
    %59 = arith.addf %57, %58 : vector<32x16xf32>
    %cst_24 = arith.constant 0.000000e+00 : f32
    %60 = vector.broadcast %cst_24 : f32 to vector<32x16xf32>
    %61 = arith.maximumf %59, %60 : vector<32x16xf32>
    %c0_25 = arith.constant 0 : index
    %c0_26 = arith.constant 0 : index
    %62 = vector.load %arg6[%c0_25, %c0_26] : memref<4x32xf32, #tpu.memory_space<vmem>>, vector<4x32xf32>
    %63 = vector.broadcast %4 : vector<32x1xf32> to vector<32x32xf32>
    %64 = arith.mulf %63, %1 : vector<32x32xf32>
    %65 = vector.broadcast %4 : vector<32x1xf32> to vector<32x16xf32>
    %66 = arith.mulf %65, %61 : vector<32x16xf32>
    %cst_27 = arith.constant dense<0.000000e+00> : vector<4x32xf32>
    %67 = tpu.matmul %62, %64, %cst_27 {dimension_numbers = #tpu.dot_dimension_numbers<[1], [0], [0], [1], [0, 0, 1, 1], [], []>} : vector<4x32xf32>, vector<32x32xf32>, vector<4x32xf32> -> vector<4x32xf32>
    %cst_28 = arith.constant dense<0.000000e+00> : vector<4x16xf32>
    %68 = tpu.matmul %62, %66, %cst_28 {dimension_numbers = #tpu.dot_dimension_numbers<[1], [0], [0], [1], [0, 0, 1, 1], [], []>} : vector<4x32xf32>, vector<32x16xf32>, vector<4x16xf32> -> vector<4x16xf32>
    %c0_29 = arith.constant 0 : index
    %c0_30 = arith.constant 0 : index
    %69 = vector.load %arg5[%c0_29, %c0_30] : memref<49x32xf32, #tpu.memory_space<vmem>>, vector<32x32xf32>
    %c32 = arith.constant 32 : index
    %c0_31 = arith.constant 0 : index
    %70 = vector.load %arg5[%c32, %c0_31] : memref<49x32xf32, #tpu.memory_space<vmem>>, vector<16x32xf32>
    %c48 = arith.constant 48 : index
    %c0_32 = arith.constant 0 : index
    %71 = vector.load %arg5[%c48, %c0_32] : memref<49x32xf32, #tpu.memory_space<vmem>>, vector<1x32xf32>
    %cst_33 = arith.constant dense<0.000000e+00> : vector<4x32xf32>
    %72 = tpu.matmul %67, %69, %cst_33 {dimension_numbers = #tpu.dot_dimension_numbers<[1], [0], [0], [1], [0, 0, 1, 1], [], []>} : vector<4x32xf32>, vector<32x32xf32>, vector<4x32xf32> -> vector<4x32xf32>
    %cst_34 = arith.constant dense<0.000000e+00> : vector<4x32xf32>
    %73 = tpu.matmul %68, %70, %cst_34 {dimension_numbers = #tpu.dot_dimension_numbers<[1], [0], [0], [1], [0, 0, 1, 1], [], []>} : vector<4x16xf32>, vector<16x32xf32>, vector<4x32xf32> -> vector<4x32xf32>
    %74 = arith.addf %72, %73 : vector<4x32xf32>
    %75 = vector.broadcast %71 : vector<1x32xf32> to vector<4x32xf32>
    %76 = arith.addf %74, %75 : vector<4x32xf32>
    %cst_35 = arith.constant 0.000000e+00 : f32
    %77 = vector.broadcast %cst_35 : f32 to vector<4x32xf32>
    %78 = arith.maximumf %76, %77 : vector<4x32xf32>
    %c0_36 = arith.constant 0 : index
    %c0_37 = arith.constant 0 : index
    %c0_38 = arith.constant 0 : index
    %79 = vector.load %arg7[%c0_36, %c0_37, %c0_38] : memref<1x4x32xf32, #tpu.memory_space<vmem>>, vector<1x4x32xf32>
    %80 = vector.shape_cast %79 : vector<1x4x32xf32> to vector<4x32xf32>
    %81 = vector.shape_cast %78 : vector<4x32xf32> to vector<1x4x32xf32>
    tpu.vector_store %arg7[%c0_36, %c0_37, %c0_38], %81 {strides = array<i32>} : memref<1x4x32xf32, #tpu.memory_space<vmem>>, vector<1x4x32xf32>,
    return
  }
  func.func @transform_0(%arg0: i32) -> (i32, i32, i32) {
    %c0_i32 = arith.constant 0 : i32
    %c0_i32_0 = arith.constant 0 : i32
    %c0_i32_1 = arith.constant 0 : i32
    return %arg0, %c0_i32, %c0_i32_0 : i32, i32, i32
  }
  func.func @transform_1(%arg0: i32) -> (i32, i32, i32) {
    %c0_i32 = arith.constant 0 : i32
    %c0_i32_0 = arith.constant 0 : i32
    %c0_i32_1 = arith.constant 0 : i32
    return %arg0, %c0_i32, %c0_i32_0 : i32, i32, i32
  }
  func.func @transform_2(%arg0: i32) -> (i32, i32) {
    %c0_i32 = arith.constant 0 : i32
    %c0_i32_0 = arith.constant 0 : i32
    %c0_i32_1 = arith.constant 0 : i32
    return %c0_i32, %c0_i32_0 : i32, i32
  }
  func.func @transform_3(%arg0: i32) -> (i32, i32) {
    %c0_i32 = arith.constant 0 : i32
    %c0_i32_0 = arith.constant 0 : i32
    %c0_i32_1 = arith.constant 0 : i32
    return %c0_i32, %c0_i32_0 : i32, i32
  }
  func.func @transform_4(%arg0: i32) -> (i32, i32) {
    %c0_i32 = arith.constant 0 : i32
    %c0_i32_0 = arith.constant 0 : i32
    %c0_i32_1 = arith.constant 0 : i32
    return %c0_i32, %c0_i32_0 : i32, i32
  }
  func.func @transform_5(%arg0: i32) -> (i32, i32) {
    %c0_i32 = arith.constant 0 : i32
    %c0_i32_0 = arith.constant 0 : i32
    %c0_i32_1 = arith.constant 0 : i32
    return %c0_i32, %c0_i32_0 : i32, i32
  }
  func.func @transform_6(%arg0: i32) -> (i32, i32, i32) {
    %c0_i32 = arith.constant 0 : i32
    %c0_i32_0 = arith.constant 0 : i32
    %c0_i32_1 = arith.constant 0 : i32
    return %arg0, %c0_i32, %c0_i32_0 : i32, i32, i32
  }
}

</mosaic_0001>

<bundles_post_ra>
// kernel: tpu_custom_call.1
= control target key start
LH: loop header
LB: loop body
LE: loop exit
PB: predicated region body
PF: predicated region fallthrough
CT: control target
= control target key end

     0   :  { %s738_s0 = inlined_call_operand.vmem [shape: f32[1,32,32], index: 0, kind: input, shape index: {}]   ;;  %s739_s1 = inlined_call_operand.vmem [shape: f32[1,32,1], index: 1, kind: input, shape index: {}]   ;;  %s740_s2 = inlined_call_operand.vmem [shape: f32[32,16], index: 2, kind: input, shape index: {}]   ;;  %s741_s3 = inlined_call_operand.vmem [shape: f32[8,2], index: 3, kind: input, shape index: {}]   ;;  %s742_s4 = inlined_call_operand.vmem [shape: f32[49,32], index: 4, kind: input, shape index: {}]   ;;  %s743_s5 = inlined_call_operand.vmem [shape: f32[4,32], index: 5, kind: input, shape index: {}]   ;;  %s744_s6 = inlined_call_operand.hbm [shape: f32[1,4,32], index: 6, kind: output, shape index: {}]  }
   0x1   :  { %v43_v0 = vld [vmem:[%s740_s2 + $0x18] sm:$0xff]  ;;  %v42_v1 = vld [vmem:[%s740_s2 + $0x10] sm:$0xff]  ;;  %v41_v2 = vld [vmem:[%s740_s2 + $0x8] sm:$0xff] }
   0x2   :  { %69 = vmatpush.msra.mxu0 %v43_v0 }
   0x4   :  { %70 = vmatpush.msra.mxu0 %v42_v1 }
   0x5   :  { %11 = vsyncpa [#allocation3], 0  ;;  %v40_v3 = vld [vmem:[%s740_s2] sm:$0xff]  ;;  %vm44_vm0 = vcmask 261120   ;;  %v620_v5 = vld [vmem:[%s738_s0 + $0x8] sm:$0xff]  ;;  %vm86_vm1 = vcmask 130048   ;;  %v115_v24 = vlaneseq }
   0x6   :  { %71 = vmatpush.msra.mxu0 %v41_v2  ;;  %v613_v4 = vld [vmem:[%s738_s0] sm:$0xff]  ;;  %v627_v6 = vld [vmem:[%s738_s0 + $0x10] sm:$0xff]  ;;  %v634_v7 = vld [vmem:[%s738_s0 + $0x18] sm:$0xff]  ;;  %v558_v34 = vmov 0.0   ;;  %vm217_vm11 = vcmask 64512   ;;  %s559_s13 = smov 1  }
   0x7   :  { %v666_v25 = vshrl.u32 %v115_v24, 7  ;;  %v118_v29 = vand.u32 127, %v115_v24  ;;  %v173_v53 = vld [vmem:[%s741_s3] sm:$0xff]  ;;  %v560_v1 = vmov 0   ;;  %v31_v2 = vld [vmem:[%s739_s1 + $0x18] sm:$0xff]  ;;  %s561_s17 = smov 127  }
   0x8   :  { %72 = vmatpush.msra.mxu0 %v40_v3  ;;  %520 = vset.pattern.permute.xlu2 %v560_v1  ;;  %v29_v3 = vld [vmem:[%s739_s1 + $0x8] sm:$0xff]  ;;  %s562_s11 = smov [#allocation2]   ;;  %s481_s3 = sshll.u32 %s744_s6, 4  ;;  %s482_s3 = int_to_ptr.hbm [resolvable:$true] %s481_s3 }
   0x9   :  { %490 = vmatmul.msk.f32.vlgmr.msra.gmra.mxu0 %vm44_vm0, %v613_v4  ;;  %v119_v27 = vmul.u32 4, %v666_v25  ;;  %v195_v46 = vmul.u32 4, %v118_v29  ;;  %v192_v55 = vadd.s32 8, %v666_v25  ;;  %v193_v60 = vadd.s32 16, %v666_v25  ;;  %518 = vset.pattern.permute.xlu1 %v560_v1  ;;  %s479_s0 = sshll.u32 %s562_s11, 4  ;;  %s480_s0 = int_to_ptr.vmem [resolvable:$true] %s479_s0 }
   0xa   :  { %v194_v62 = vadd.s32 24, %v666_v25  ;;  %519 = vset.pattern.permute.xlu0 %v560_v1 }
   0xb   :  { %v121_v30 = vadd.s32 4, %v119_v27  ;;  %vm120_vm2 = vcmp.ge.s32.totalorder %v118_v29, %v119_v27  ;;  %v200_v49 = vadd.s32 4, %v195_v46  ;;  %vm196_vm5 = vcmp.ge.s32.totalorder %v666_v25, %v195_v46 }
   0xc   :  { %vm197_vm12 = vcmp.ge.s32.totalorder %v192_v55, %v195_v46  ;;  %vm198_vm15 = vcmp.ge.s32.totalorder %v193_v60, %v195_v46 }
   0xd   :  { %vm122_vm3 = vcmp.lt.s32.totalorder %v118_v29, %v121_v30  ;;  %vm201_vm6 = vcmp.lt.s32.totalorder %v666_v25, %v200_v49  ;;  %vm202_vm13 = vcmp.lt.s32.totalorder %v192_v55, %v200_v49 }
   0xe   :  { %vm123_vm4 = vmand %vm120_vm2, %vm122_vm3  ;;  %vm203_vm2 = vcmp.lt.s32.totalorder %v193_v60, %v200_v49 }
   0xf   :  { %v494_v35 = vsel %vm123_vm4, 1.0, %v558_v34  ;;  %vm205_vm9 = vmand %vm196_vm5, %vm201_vm6  ;;  %vm199_vm4 = vcmp.ge.s32.totalorder %v194_v62, %v195_v46  ;;  %vm204_vm5 = vcmp.lt.s32.totalorder %v194_v62, %v200_v49  ;;  %v421_v62 = vld [vmem:[%s742_s4 + $0x28] sm:$0xff] }
  0x10   :  { %v497_v58 = vsel %vm205_vm9, 1.0, %v558_v34  ;;  %vm206_vm14 = vmand %vm197_vm12, %vm202_vm13 }
  0x11   :  { %491 = vmatmul.msk.f32.gmra.mxu0 %vm44_vm0, %v620_v5  ;;  %v498_v61 = vsel %vm206_vm14, 1.0, %v558_v34  ;;  %vm207_vm3 = vmand %vm198_vm15, %vm203_vm2 }
  0x12   :  { %v499_v63 = vsel %vm207_vm3, 1.0, %v558_v34  ;;  %vm208_vm6 = vmand %vm199_vm4, %vm204_vm5 }
  0x13   :  { %v500_v0 = vsel %vm208_vm6, 1.0, %v558_v34 }
  0x19   :  { %492 = vmatmul.msk.f32.gmra.mxu0 %vm44_vm0, %v627_v6 }
  0x21   :  { %493 = vmatmul.msk.f32.gmra.mxu0 %vm44_vm0, %v634_v7 }
  0x86   :  { %v638_v8 = vpop.f32.mrf.mxu0 }
  0x87   :  { %v99_v16 = vmul.f32 %v638_v8, %v638_v8  ;;  %v87_v22 = vsel %vm86_vm1, %v638_v8, 0.0 }
  0x89   :  { %v103_v19 = vsel %vm86_vm1, %v99_v16, 0.0 }
  0x8e   :  { %v640_v9 = vpop.f32.mrf.mxu0 }
  0x8f   :  { %v100_v10 = vmul.f32 %v640_v9, %v640_v9  ;;  %v90_v23 = vsel %vm86_vm1, %v640_v9, 0.0 }
  0x91   :  { %v106_v11 = vsel %vm86_vm1, %v100_v10, 0.0 }
  0x92   :  { %107 = vadd.xlane.f32.xlu1 %v106_v11  ;;  %v38_v11 = vmul.f32 1.442695, %v31_v2  ;;  %v521_v2 = vld [vmem:[%s742_s4 + $0x30] ss:$0 sm:$0xff] }
  0x96   :  { %v645_v12 = vpop.f32.mrf.mxu0 }
  0x97   :  { %v93_v13 = vsel %vm86_vm1, %v645_v12, 0.0  ;;  %v101_v14 = vmul.f32 %v645_v12, %v645_v12 }
  0x98   :  { %94 = vadd.xlane.f32.xlu2 %v93_v13  ;;  %v34_v13 = vmul.f32 1.442695, %v29_v3 }
  0x99   :  { %v109_v15 = vsel %vm86_vm1, %v101_v14, 0.0 }
  0x9a   :  { %110 = vadd.xlane.f32.xlu0 %v109_v15  ;;  %v28_v15 = vld [vmem:[%s739_s1] sm:$0xff] }
  0x9e   :  { %v654_v17 = vpop.f32.mrf.mxu0 }
  0x9f   :  { %v102_v18 = vmul.f32 %v654_v17, %v654_v17  ;;  %v96_v20 = vsel %vm86_vm1, %v654_v17, 0.0 }
  0xa0   :  { %104 = vadd.xlane.f32.xlu2 %v103_v19  ;;  %97 = vadd.xlane.f32.xlu1 %v96_v20 }
  0xa1   :  { %v112_v21 = vsel %vm86_vm1, %v102_v18, 0.0  ;;  %v32_v18 = vmul.f32 1.442695, %v28_v15 }
  0xa2   :  { %113 = vadd.xlane.f32.xlu0 %v112_v21 }
  0xa8   :  { %88 = vadd.xlane.f32.xlu1 %v87_v22 }
  0xaa   :  { %91 = vadd.xlane.f32.xlu0 %v90_v23 }
 0x105   :  { %v108_v26 = vpop.xlane.xlu1 %107 }
 0x10b   :  { %v95_v31 = vpop.xlane.xlu2 %94 }
 0x10d   :  { %v111_v28 = vpop.xlane.xlu0 %110 }
 0x113   :  { %v98_v32 = vpop.xlane.xlu1 %97  ;;  %v105_v36 = vpop.xlane.xlu2 %104 }
 0x114   :  { %141 = vmatpush.msra.mxu1 %v98_v32 }
 0x115   :  { %v114_v33 = vpop.xlane.xlu0 %113 }
 0x116   :  { %142 = vmatpush.msra.mxu1 %v95_v31  ;;  %162 = vmatpush.msra.mxu2 %v114_v33 }
 0x118   :  { %163 = vmatpush.msra.mxu2 %v111_v28 }
 0x11a   :  { %164 = vmatpush.msra.mxu2 %v108_v26  ;;  %v30_v26 = vld [vmem:[%s739_s1 + $0x10] sm:$0xff] }
 0x11b   :  { %v89_v38 = vpop.xlane.xlu1 %88  ;;  %v36_v27 = vmul.f32 1.442695, %v30_v26 }
 0x11c   :  { %165 = vmatpush.msra.mxu2 %v105_v36 }
 0x11d   :  { %496 = vmatmul.msk.f32.vlgmr.msra.gmra.mxu2 %vm44_vm0, %v494_v35  ;;  %v92_v37 = vpop.xlane.xlu0 %91 }
 0x11e   :  { %143 = vmatpush.msra.mxu1 %v92_v37 }
 0x120   :  { %144 = vmatpush.msra.mxu1 %v89_v38 }
 0x121   :  { %495 = vmatmul.msk.f32.vlgmr.msra.gmra.mxu1 %vm44_vm0, %v494_v35 }
 0x19e   :  { %v146_v39 = vpop.f32.mrf.mxu1 }
 0x19f   :  { %v149_v40 = vmul.f32 0.015625, %v146_v39 }
 0x1a0   :  { %v167_v41 = vpop.f32.mrf.mxu2 }
 0x1a1   :  { %v171_v42 = vmul.f32 %v149_v40, %v149_v40  ;;  %v170_v43 = vmul.f32 0.015625, %v167_v41  ;;  %v344_v41 = vld [vmem:[%s743_s5] sm:$0xf] }
 0x1a3   :  { %v172_v44 = vsub.f32 %v170_v43, %v171_v42  ;;  %v419_v42 = vld [vmem:[%s742_s4 + $0x18] sm:$0xff] }
 0x1a5   :  { %v174_v45 = vadd.f32 1e-05, %v172_v44 }
 0x1a7   :  { %522 = vrsqrt.f32 %v174_v45  ;;  %vm181_vm8 = vweird.f32 %v174_v45 }
 0x1a8   :  { %524 = vpow2.f32 %v38_v11 }
 0x1a9   :  { %526 = vpow2.f32 %v34_v13 }
 0x1aa   :  { %528 = vpow2.f32 %v32_v18 }
 0x1ab   :  { %530 = vpow2.f32 %v36_v27 }
 0x1ad   :  { %v523_v47 = vpop.eup %522 }
 0x1ae   :  { %v176_v48 = vmul.f32 %v523_v47, %v174_v45  ;;  %vm182_vm7 = vweird.f32 %v523_v47  ;;  %v525_v16 = vpop.eup %524 }
 0x1af   :  { %vm183_vm10 = vmor %vm181_vm8, %vm182_vm7  ;;  %v527_v19 = vpop.eup %526  ;;  %362 = vperm.xlu1 %518, %v525_v16  }
 0x1b0   :  { %v177_v50 = vmul.f32 %v523_v47, %v176_v48  ;;  %v529_v20 = vpop.eup %528 }
 0x1b1   :  { %v531_v28 = vpop.eup %530 }
 0x1b2   :  { %v178_v51 = vmul.f32 0.5, %v177_v50 }
 0x1b4   :  { %v179_v52 = vsub.f32 1.5, %v178_v51 }
 0x1b6   :  { %v180_v54 = vmul.f32 %v523_v47, %v179_v52 }
 0x1b8   :  { %v184_v56 = vsel %vm183_vm10, %v523_v47, %v180_v54 }
 0x1b9   :  { %v185_v57 = vmul.f32 %v184_v56, %v173_v53 }
 0x1bb   :  { %v186_v59 = vmul.f32 %v185_v57, %v149_v40  ;;  %245 = vmatpush.msra.mxu3 %v185_v57 }
 0x1bc   :  { %501 = vmatmul.msk.f32.vlgmr.msra.gmra.mxu3 %vm217_vm11, %v497_v58 }
 0x1bd   :  { %188 = vrot.lane.b32.xlu2 %v186_v59, %s559_s13  ;;  %461 = vmatpush.msrb.mxu3 %v419_v42 }
 0x1c4   :  { %502 = vmatmul.msk.f32.gmra.mxu3 %vm217_vm11, %v498_v61 }
 0x1c5   :  { %352 = vperm.xlu2 %520, %v527_v19  }
 0x1cc   :  { %503 = vmatmul.msk.f32.gmra.mxu3 %vm217_vm11, %v499_v63 }
 0x1cd   :  { %347 = vperm.xlu2 %520, %v529_v20  }
 0x1d4   :  { %504 = vmatmul.msk.f32.gmra.mxu3 %vm217_vm11, %v500_v0 }
 0x217   :  { %v189_v10 = vpop.permute.xlu2 %188 }
 0x218   :  { %v191_v14 = vsub.f32 %v173_v53, %v189_v10 }
 0x21a   :  { %260 = vrot.lane.b32.xlu0 %v191_v14, %s561_s17 }
 0x21f   :  { %v353_v35 = vpop.permute.xlu2 %352 }
 0x220   :  { %v366_v38 = vmul.f32 %v353_v35, %v620_v5  ;;  %v418_v5 = vld [vmem:[%s742_s4 + $0x10] sm:$0xff] }
 0x221   :  { %v363_v33 = vpop.permute.xlu1 %362  ;;  %462 = vmatpush.msrb.mxu3 %v418_v5 }
 0x222   :  { %357 = vperm.xlu0 %519, %v531_v28   ;;  %v368_v34 = vmul.f32 %v363_v33, %v634_v7 }
 0x224   :  { %388 = vmatpush.msrb.mxu2 %v368_v34 }
 0x227   :  { %v348_v39 = vpop.permute.xlu2 %347 }
 0x228   :  { %v365_v40 = vmul.f32 %v348_v39, %v613_v4 }
 0x23f   :  { %v247_v21 = vpop.f32.mrf.mxu3 }
 0x247   :  { %v250_v22 = vpop.f32.mrf.mxu3 }
 0x248   :  { %299 = vperm.xlu1 %518, %v250_v22  }
 0x24f   :  { %v253_v23 = vpop.f32.mrf.mxu3 }
 0x250   :  { %304 = vperm.xlu2 %520, %v253_v23  }
 0x257   :  { %v256_v24 = vpop.f32.mrf.mxu3 }
 0x258   :  { %309 = vperm.xlu2 %520, %v256_v24  }
 0x28c   :  { %v261_v25 = vpop.permute.xlu0 %260 }
 0x28d   :  { %278 = vmatpush.msrb.mxu1 %v261_v25 }
 0x28e   :  { %505 = vmatmul.msk.f32.vlgmr.msrb.gmra.mxu1 %vm217_vm11, %v497_v58 }
 0x294   :  { %v358_v36 = vpop.permute.xlu0 %357 }
 0x295   :  { %v367_v37 = vmul.f32 %v358_v36, %v627_v6 }
 0x296   :  { %506 = vmatmul.msk.f32.gmra.mxu1 %vm217_vm11, %v498_v61  ;;  %v417_v61 = vld [vmem:[%s742_s4 + $0x8] sm:$0xff] }
 0x297   :  { %389 = vmatpush.msrb.mxu2 %v367_v37  ;;  %463 = vmatpush.msrb.mxu3 %v417_v61 }
 0x299   :  { %390 = vmatpush.msrb.mxu2 %v366_v38 }
 0x29b   :  { %391 = vmatpush.msrb.mxu2 %v365_v40 }
 0x29c   :  { %509 = vmatmul.msk.f32.vlgmr.msrb.gmra.mxu2 %vm44_vm0, %v344_v41 }
 0x29e   :  { %507 = vmatmul.msk.f32.gmra.mxu1 %vm217_vm11, %v499_v63 }
 0x2a6   :  { %508 = vmatmul.msk.f32.gmra.mxu1 %vm217_vm11, %v500_v0  ;;  %v420_v0 = vld [vmem:[%s742_s4 + $0x20] sm:$0xff] }
 0x2aa   :  { %v305_v7 = vpop.permute.xlu2 %304 }
 0x2ab   :  { %v314_v44 = vmul.f32 %v305_v7, %v645_v12 }
 0x2b2   :  { %v310_v43 = vpop.permute.xlu2 %309 }
 0x2b3   :  { %v315_v45 = vmul.f32 %v310_v43, %v654_v17 }
 0x2ba   :  { %v300_v4 = vpop.permute.xlu1 %299 }
 0x2bb   :  { %v313_v46 = vmul.f32 %v300_v4, %v640_v9 }
 0x30b   :  { %v280_v29 = vpop.f32.mrf.mxu1 }
 0x30c   :  { %318 = vperm.xlu2 %520, %v280_v29  }
 0x313   :  { %v283_v30 = vpop.f32.mrf.mxu1 }
 0x31b   :  { %v286_v31 = vpop.f32.mrf.mxu1 }
 0x31c   :  { %328 = vperm.xlu0 %519, %v286_v31  }
 0x31f   :  { %v393_v63 = vpop.f32.mrf.mxu2 }
 0x323   :  { %v289_v32 = vpop.f32.mrf.mxu1 }
 0x324   :  { %323 = vperm.xlu0 %519, %v283_v30   ;;  %333 = vperm.xlu1 %518, %v289_v32  }
 0x32c   :  { %294 = vperm.xlu1 %518, %v247_v21  }
 0x366   :  { %v319_v12 = vpop.permute.xlu2 %318 }
 0x38e   :  { %v329_v6 = vpop.permute.xlu0 %328 }
 0x38f   :  { %v338_v47 = vadd.f32 %v329_v6, %v314_v44 }
 0x391   :  { %v342_v52 = vmax.f32 %v338_v47, 0.0 }
 0x393   :  { %v371_v56 = vmul.f32 %v358_v36, %v342_v52 }
 0x396   :  { %v324_v48 = vpop.permute.xlu0 %323  ;;  %v334_v49 = vpop.permute.xlu1 %333 }
 0x397   :  { %v337_v50 = vadd.f32 %v324_v48, %v313_v46  ;;  %v339_v51 = vadd.f32 %v334_v49, %v315_v45 }
 0x399   :  { %v343_v53 = vmax.f32 %v339_v51, 0.0  ;;  %v341_v54 = vmax.f32 %v337_v50, 0.0 }
 0x39b   :  { %v372_v55 = vmul.f32 %v363_v33, %v343_v53  ;;  %v370_v58 = vmul.f32 %v353_v35, %v341_v54 }
 0x39d   :  { %408 = vmatpush.msra.mxu2 %v372_v55 }
 0x39e   :  { %v295_v57 = vpop.permute.xlu1 %294 }
 0x39f   :  { %v312_v59 = vmul.f32 %v295_v57, %v638_v8  ;;  %409 = vmatpush.msra.mxu2 %v371_v56  ;;  %v416_v8 = vld [vmem:[%s742_s4] sm:$0xff] }
 0x3a0   :  { %464 = vmatpush.msrb.mxu3 %v416_v8 }
 0x3a1   :  { %v336_v17 = vadd.f32 %v319_v12, %v312_v59  ;;  %410 = vmatpush.msra.mxu2 %v370_v58  ;;  %512 = vmatmul.msk.f32.vlgmr.msrb.gmra.mxu3 %vm44_vm0, %v393_v63 }
 0x3a3   :  { %v340_v9 = vmax.f32 %v336_v17, 0.0 }
 0x3a5   :  { %v369_v60 = vmul.f32 %v348_v39, %v340_v9 }
 0x3a7   :  { %411 = vmatpush.msra.mxu2 %v369_v60 }
 0x3a8   :  { %510 = vmatmul.msk.f32.vlgmr.msra.gmra.mxu2 %vm44_vm0, %v344_v41  ;;  %vm472_vm0 = vcmask 257024  }
 0x3a9   :  { %440 = vmatpush.msrb.mxu2 %v421_v62 }
 0x3ab   :  { %441 = vmatpush.msrb.mxu2 %v420_v0 }
 0x424   :  { %v466_v3 = vpop.f32.mrf.mxu3 }
 0x42b   :  { %v413_v1 = vpop.f32.mrf.mxu2 }
 0x42c   :  { %511 = vmatmul.msk.f32.vlgmr.msrb.gmra.mxu2 %vm86_vm1, %v413_v1 }
 0x4af   :  { %v443_v10 = vpop.f32.mrf.mxu2 }
 0x4b0   :  { %v467_v11 = vadd.f32 %v466_v3, %v443_v10 }
 0x4b2   :  { %v470_v13 = vadd.f32 %v521_v2, %v467_v11 }
 0x4b4   :  { %v471_v14 = vmax.f32 %v470_v13, 0.0 }
 0x4b6   :  { %473 = vst.msk [vmem:[#allocation2] sm:$0xf] %vm472_vm0, %v471_v14 }
 0x4b7   :  { %484 = dma.vmem_to_hbm [thread:$0]  %s480_s0, 64, %s482_s3, [#allocation3]  }
 0x4b8   :  { %556 = dma.done.wait [#allocation3], 64  }
 0x4b9   :  { %557 = vsyncadd [#allocation3], 4294967232 }
 0x4ba   :  { %489 = vsyncpa [#allocation3], 1 }

</bundles_post_ra>
